<compile_context>
chip_gen: v7x
topology: tpu7x:2x2x1
jax: 0.10.0
libtpu: 0.0.40
codegen_flags: <defaults>
</compile_context>

<pallas_src>
import jax
import jax.numpy as jnp
from jax.experimental import pallas as pl
from jax.experimental.pallas import tpu as pltpu


def merge_layer_kernel(x1_ref, x2_ref, w1a_ref, w1b_ref, b1_ref, w2_ref, b2_ref, o_ref):
    x1 = x1_ref[...]
    x2 = x2_ref[...]
    # fc1 on the un-concatenated inputs: h = x1 @ W1[:dim1] + x2 @ W1[dim1:]  (f32 MXU passes).
    h = jnp.dot(x1, w1a_ref[...], precision=jax.lax.Precision.HIGHEST,
                preferred_element_type=jnp.float32)
    h = h + jnp.dot(x2, w1b_ref[...], precision=jax.lax.Precision.HIGHEST,
                    preferred_element_type=jnp.float32)
    h = jnp.maximum(h + b1_ref[...], 0.0)                      # bias + ReLU (VPU, f32)
    out = jnp.dot(h, w2_ref[...], precision=jax.lax.Precision.HIGHEST,
                  preferred_element_type=jnp.float32)
    o_ref[...] = (out + b2_ref[...] + x2).astype(o_ref.dtype)  # bias + residual (x2 reused)


def _round_up(x, m):
    return (x + m - 1) // m * m


def merge_layer(x1, x2, w1, b1, w2, b2, *, block_b=1024):
    """PyTorch MergeLayer forward.

    w1: (dim1+dim2, dim3), b1: (dim3,), w2: (dim3, dim4), b2: (dim4,)
    (weights stored transposed vs. torch.nn.Linear, i.e. (in_features, out_features)).
    """
    B, dim1 = x1.shape
    B2, dim2 = x2.shape
    K, dim3 = w1.shape
    dim4 = w2.shape[1]
    assert B == B2 and K == dim1 + dim2
    assert dim4 == dim2, "residual add requires dim4 == dim2"

    # Batch tile: multiple of 8 sublanes, capped at block_b, but small enough to keep >=8 grid
    # steps when the batch allows (so v7x's two TensorCores both get work).  No batch padding:
    # the ragged last tile is handled by Pallas masking.
    TB = min(_round_up(block_b, 8), max(8, _round_up(pl.cdiv(B, 8), 8)))
    grid = (pl.cdiv(B, TB),)

    # Split W1 so fc1 runs on un-concatenated inputs; everything stays f32 and resident in VMEM
    # (constant index_map) — these are tiny (KBs).
    w1a = w1[:dim1].astype(jnp.float32)
    w1b = w1[dim1:].astype(jnp.float32)
    w2f = w2.astype(jnp.float32)
    b1r = b1.reshape(1, dim3).astype(jnp.float32)
    b2r = b2.reshape(1, dim4).astype(jnp.float32)

    itemsize = 4  # f32
    flops = 2 * B * (K * dim3 + dim3 * dim4)
    bytes_accessed = itemsize * (x1.size + x2.size + w1.size + w2.size
                                 + b1.size + b2.size + B * dim4)

    # VMEM budget: double-buffered activation/output tiles + (double-buffer-allocated) resident
    # weights/biases + the f32 intermediate h; 2x headroom, still a few MiB on every generation.
    weight_bytes = itemsize * (w1a.size + w1b.size + w2f.size + b1r.size + b2r.size)
    tile_bytes = itemsize * TB * (dim1 + dim2 + dim4)
    vmem_bytes = 2 * (weight_bytes + tile_bytes) + itemsize * TB * dim3
    vmem_limit = int(min(16 << 20, max(2 << 20, 2 * vmem_bytes)))

    out = pl.pallas_call(
        merge_layer_kernel,
        out_shape=jax.ShapeDtypeStruct((B, dim4), x1.dtype),
        grid=grid,
        in_specs=[
            pl.BlockSpec((TB, dim1), lambda i: (i, 0)),      # x1 tile
            pl.BlockSpec((TB, dim2), lambda i: (i, 0)),      # x2 tile (fc1 operand + residual)
            pl.BlockSpec((dim1, dim3), lambda i: (0, 0)),    # W1a (resident)
            pl.BlockSpec((dim2, dim3), lambda i: (0, 0)),    # W1b (resident)
            pl.BlockSpec((1, dim3), lambda i: (0, 0)),       # b1  (resident)
            pl.BlockSpec((dim3, dim4), lambda i: (0, 0)),    # W2  (resident)
            pl.BlockSpec((1, dim4), lambda i: (0, 0)),       # b2  (resident)
        ],
        out_specs=pl.BlockSpec((TB, dim4), lambda i: (i, 0)),
        compiler_params=pltpu.CompilerParams(
            dimension_semantics=("parallel",),
            vmem_limit_bytes=vmem_limit,
        ),
        cost_estimate=pl.CostEstimate(
            flops=flops, transcendentals=0, bytes_accessed=bytes_accessed),
    )(x1, x2, w1a, w1b, b1r, w2f, b2r)
    return out


if __name__ == "__main__":
    # Shapes implied by MergeLayer(dim1, dim2, dim3, dim4); the residual forces dim4 == dim2.
    B, dim1, dim2, dim3 = 8, 32, 32, 64
    dim4 = dim2

    key = jax.random.PRNGKey(0)
    k_x1, k_x2, k_w1, k_b1, k_w2, k_b2 = jax.random.split(key, 6)

    x1 = jax.random.normal(k_x1, (B, dim1), dtype=jnp.float32)
    x2 = jax.random.normal(k_x2, (B, dim2), dtype=jnp.float32)

    # Deterministic parameter init (xavier-normal weights, like the module's __init__).
    std1 = (2.0 / ((dim1 + dim2) + dim3)) ** 0.5
    std2 = (2.0 / (dim3 + dim4)) ** 0.5
    w1 = std1 * jax.random.normal(k_w1, (dim1 + dim2, dim3), dtype=jnp.float32)
    w2 = std2 * jax.random.normal(k_w2, (dim3, dim4), dtype=jnp.float32)
    # PyTorch Linear default bias init: uniform(-1/sqrt(fan_in), 1/sqrt(fan_in)).
    b1 = jax.random.uniform(k_b1, (dim3,), dtype=jnp.float32,
                            minval=-1.0 / (dim1 + dim2) ** 0.5,
                            maxval=1.0 / (dim1 + dim2) ** 0.5)
    b2 = jax.random.uniform(k_b2, (dim4,), dtype=jnp.float32,
                            minval=-1.0 / dim3 ** 0.5,
                            maxval=1.0 / dim3 ** 0.5)

    out = merge_layer(x1, x2, w1, b1, w2, b2)
    out = jax.block_until_ready(out)

    # Pure-JAX f32 reference (kernel is all-f32 now -> tight tolerance).
    x_cat = jnp.concatenate([x1, x2], axis=1)
    h_ref = jnp.maximum(x_cat @ w1 + b1, 0.0)
    ref = h_ref @ w2 + b2 + x2
    assert out.shape == (B, dim4)
    assert jnp.allclose(out, ref, atol=1e-4, rtol=1e-4), "mismatch vs reference"

    print("KERNEL_OK")
</pallas_src>

<mosaic_0001>
module attributes {stable_mosaic.version = 11 : i64} {
  func.func @merge_layer_kernel(%arg0: i32, %arg1: memref<8x32xf32, #tpu.memory_space<vmem>>, %arg2: memref<8x32xf32, #tpu.memory_space<vmem>>, %arg3: memref<32x64xf32, #tpu.memory_space<vmem>>, %arg4: memref<32x64xf32, #tpu.memory_space<vmem>>, %arg5: memref<1x64xf32, #tpu.memory_space<vmem>>, %arg6: memref<64x32xf32, #tpu.memory_space<vmem>>, %arg7: memref<1x32xf32, #tpu.memory_space<vmem>>, %arg8: memref<8x32xf32, #tpu.memory_space<vmem>>) attributes {dimension_semantics = [#tpu.dimension_semantics<parallel>], iteration_bounds = array<i64: 1>, scalar_prefetch = 0 : i64, scratch_operands = 0 : i64, tpu.core_type = #tpu.core_type<tc>, window_params = [{transform_indices = @transform_0, window_bounds = array<i64: 8, 32>}, {transform_indices = @transform_1, window_bounds = array<i64: 8, 32>}, {pipeline_mode = #tpu.pipeline_mode<synchronous>, transform_indices = @transform_2, window_bounds = array<i64: 32, 64>}, {pipeline_mode = #tpu.pipeline_mode<synchronous>, transform_indices = @transform_3, window_bounds = array<i64: 32, 64>}, {pipeline_mode = #tpu.pipeline_mode<synchronous>, transform_indices = @transform_4, window_bounds = array<i64: 1, 64>}, {pipeline_mode = #tpu.pipeline_mode<synchronous>, transform_indices = @transform_5, window_bounds = array<i64: 64, 32>}, {pipeline_mode = #tpu.pipeline_mode<synchronous>, transform_indices = @transform_6, window_bounds = array<i64: 1, 32>}, {transform_indices = @transform_7, window_bounds = array<i64: 8, 32>}]} {
    %c0 = arith.constant 0 : index
    %c0_0 = arith.constant 0 : index
    %0 = vector.load %arg1[%c0, %c0_0] : memref<8x32xf32, #tpu.memory_space<vmem>>, vector<8x32xf32>
    %c0_1 = arith.constant 0 : index
    %c0_2 = arith.constant 0 : index
    %1 = vector.load %arg2[%c0_1, %c0_2] : memref<8x32xf32, #tpu.memory_space<vmem>>, vector<8x32xf32>
    %c0_3 = arith.constant 0 : index
    %c0_4 = arith.constant 0 : index
    %2 = vector.load %arg3[%c0_3, %c0_4] : memref<32x64xf32, #tpu.memory_space<vmem>>, vector<32x64xf32>
    %cst = arith.constant dense<0.000000e+00> : vector<8x64xf32>
    %3 = tpu.matmul %0, %2, %cst {dimension_numbers = #tpu.dot_dimension_numbers<[1], [0], [0], [1], [0, 0, 1, 1], [], []>, precision = #tpu.contract_precision<fp32>} : vector<8x32xf32>, vector<32x64xf32>, vector<8x64xf32> -> vector<8x64xf32>
    %c0_5 = arith.constant 0 : index
    %c0_6 = arith.constant 0 : index
    %4 = vector.load %arg4[%c0_5, %c0_6] : memref<32x64xf32, #tpu.memory_space<vmem>>, vector<32x64xf32>
    %cst_7 = arith.constant dense<0.000000e+00> : vector<8x64xf32>
    %5 = tpu.matmul %1, %4, %cst_7 {dimension_numbers = #tpu.dot_dimension_numbers<[1], [0], [0], [1], [0, 0, 1, 1], [], []>, precision = #tpu.contract_precision<fp32>} : vector<8x32xf32>, vector<32x64xf32>, vector<8x64xf32> -> vector<8x64xf32>
    %6 = arith.addf %3, %5 : vector<8x64xf32>
    %c0_8 = arith.constant 0 : index
    %c0_9 = arith.constant 0 : index
    %7 = vector.load %arg5[%c0_8, %c0_9] : memref<1x64xf32, #tpu.memory_space<vmem>>, vector<1x64xf32>
    %8 = vector.broadcast %7 : vector<1x64xf32> to vector<8x64xf32>
    %9 = arith.addf %6, %8 : vector<8x64xf32>
    %cst_10 = arith.constant 0.000000e+00 : f32
    %10 = vector.broadcast %cst_10 : f32 to vector<8x64xf32>
    %11 = arith.maximumf %9, %10 : vector<8x64xf32>
    %c0_11 = arith.constant 0 : index
    %c0_12 = arith.constant 0 : index
    %12 = vector.load %arg6[%c0_11, %c0_12] : memref<64x32xf32, #tpu.memory_space<vmem>>, vector<64x32xf32>
    %cst_13 = arith.constant dense<0.000000e+00> : vector<8x32xf32>
    %13 = tpu.matmul %11, %12, %cst_13 {dimension_numbers = #tpu.dot_dimension_numbers<[1], [0], [0], [1], [0, 0, 1, 1], [], []>, precision = #tpu.contract_precision<fp32>} : vector<8x64xf32>, vector<64x32xf32>, vector<8x32xf32> -> vector<8x32xf32>
    %c0_14 = arith.constant 0 : index
    %c0_15 = arith.constant 0 : index
    %14 = vector.load %arg7[%c0_14, %c0_15] : memref<1x32xf32, #tpu.memory_space<vmem>>, vector<1x32xf32>
    %15 = vector.broadcast %14 : vector<1x32xf32> to vector<8x32xf32>
    %16 = arith.addf %13, %15 : vector<8x32xf32>
    %17 = arith.addf %16, %1 : vector<8x32xf32>
    %c0_16 = arith.constant 0 : index
    %c0_17 = arith.constant 0 : index
    %18 = vector.load %arg8[%c0_16, %c0_17] : memref<8x32xf32, #tpu.memory_space<vmem>>, vector<8x32xf32>
    tpu.vector_store %arg8[%c0_16, %c0_17], %17 {strides = array<i32>} : memref<8x32xf32, #tpu.memory_space<vmem>>, vector<8x32xf32>,
    return
  }
  func.func @transform_0(%arg0: i32) -> (i32, i32) {
    %c0_i32 = arith.constant 0 : i32
    %c0_i32_0 = arith.constant 0 : i32
    return %arg0, %c0_i32 : i32, i32
  }
  func.func @transform_1(%arg0: i32) -> (i32, i32) {
    %c0_i32 = arith.constant 0 : i32
    %c0_i32_0 = arith.constant 0 : i32
    return %arg0, %c0_i32 : i32, i32
  }
  func.func @transform_2(%arg0: i32) -> (i32, i32) {
    %c0_i32 = arith.constant 0 : i32
    %c0_i32_0 = arith.constant 0 : i32
    %c0_i32_1 = arith.constant 0 : i32
    return %c0_i32, %c0_i32_0 : i32, i32
  }
  func.func @transform_3(%arg0: i32) -> (i32, i32) {
    %c0_i32 = arith.constant 0 : i32
    %c0_i32_0 = arith.constant 0 : i32
    %c0_i32_1 = arith.constant 0 : i32
    return %c0_i32, %c0_i32_0 : i32, i32
  }
  func.func @transform_4(%arg0: i32) -> (i32, i32) {
    %c0_i32 = arith.constant 0 : i32
    %c0_i32_0 = arith.constant 0 : i32
    %c0_i32_1 = arith.constant 0 : i32
    return %c0_i32, %c0_i32_0 : i32, i32
  }
  func.func @transform_5(%arg0: i32) -> (i32, i32) {
    %c0_i32 = arith.constant 0 : i32
    %c0_i32_0 = arith.constant 0 : i32
    %c0_i32_1 = arith.constant 0 : i32
    return %c0_i32, %c0_i32_0 : i32, i32
  }
  func.func @transform_6(%arg0: i32) -> (i32, i32) {
    %c0_i32 = arith.constant 0 : i32
    %c0_i32_0 = arith.constant 0 : i32
    %c0_i32_1 = arith.constant 0 : i32
    return %c0_i32, %c0_i32_0 : i32, i32
  }
  func.func @transform_7(%arg0: i32) -> (i32, i32) {
    %c0_i32 = arith.constant 0 : i32
    %c0_i32_0 = arith.constant 0 : i32
    return %arg0, %c0_i32 : i32, i32
  }
}

</mosaic_0001>

<bundles_post_ra>
// kernel: tpu_custom_call.1
= control target key start
LH: loop header
LB: loop body
LE: loop exit
PB: predicated region body
PF: predicated region fallthrough
CT: control target
= control target key end

     0   :  { %v2129_v3 = vmov 0.0|0.0   ;;  %vm37_vm0 = vcmask 261120   ;;  %vm2130_vm1 = vmmov 0   ;;  %v2131_v10 = vmov 0.0   ;;  %s2487_s0 = inlined_call_operand.vmem [shape: f32[8,32], index: 0, kind: input, shape index: {}]   ;;  %s2488_s1 = inlined_call_operand.vmem [shape: f32[8,32], index: 1, kind: input, shape index: {}]   ;;  %s2489_s2 = inlined_call_operand.vmem [shape: f32[32,64], index: 2, kind: input, shape index: {}]   ;;  %s2490_s3 = inlined_call_operand.vmem [shape: f32[32,64], index: 3, kind: input, shape index: {}]   ;;  %s2491_s4 = inlined_call_operand.vmem [shape: f32[1,64], index: 4, kind: input, shape index: {}]   ;;  %s2492_s5 = inlined_call_operand.vmem [shape: f32[64,32], index: 5, kind: input, shape index: {}]   ;;  %s2493_s6 = inlined_call_operand.vmem [shape: f32[1,32], index: 6, kind: input, shape index: {}]   ;;  %s2494_s7 = inlined_call_operand.hbm [shape: f32[8,32], index: 7, kind: output, shape index: {}]  }
   0x1   :  { %v33_v0 = vld [vmem:[%s2490_s3] sm:$0xff]  ;;  %v34_v1 = vld [vmem:[%s2490_s3 + $0x8] sm:$0xff]  ;;  %v35_v2 = vld [vmem:[%s2490_s3 + $0x10] sm:$0xff]  ;;  %1957 = vmatprep.subr.bf16.mxu0 %v2129_v3  ;;  %1963 = vmatprep.subr.bf16.mxu1 %v2129_v3 }
   0x2   :  { %v42_v4 = vand.u32 4294901760, %v33_v0  ;;  %v45_v5 = vand.u32 4294901760, %v34_v1  ;;  %v36_v6 = vld [vmem:[%s2490_s3 + $0x18] sm:$0xff]  ;;  %v48_v7 = vand.u32 4294901760, %v35_v2  ;;  %v2190_v8 = vld [vmem:[%s2488_s1] sm:$0xff]  ;;  %1719 = vmatprep.mubr.msk.f32.mxu0 %vm2130_vm1, %v2131_v10  ;;  %1730 = vmatprep.mubr.msk.f32.mxu1 %vm2130_vm1, %v2131_v10 }
   0x3   :  { %v51_v9 = vand.u32 4294901760, %v36_v6  ;;  %v39_v11 = vsel %vm37_vm0, %v2190_v8, 0 }
   0x4   :  { %v2198_v12 = vpack.c.bf16 %v45_v5, %v42_v4  ;;  %v122_v13 = vsub.f32 %v33_v0, %v42_v4  ;;  %v129_v14 = vsub.f32 %v34_v1, %v45_v5  ;;  %v2200_v15 = vsub.f32 %v35_v2, %v48_v7 }
   0x5   :  { %12 = vsyncpa [#allocation3], 0  ;;  %v2202_v16 = vsub.f32 %v36_v6, %v51_v9  ;;  %v2204_v17 = vand.u32 4294901760, %v39_v11  ;;  %v2207_v18 = vpack.c.bf16 %v51_v9, %v48_v7  ;;  %v29_v34 = vld [vmem:[%s2489_s2] sm:$0xff]  ;;  %v30_v35 = vld [vmem:[%s2489_s2 + $0x8] sm:$0xff]  ;;  %vm1038_vm2 = vcmask 523264  }
   0x6   :  { %1959 = vmatpush3.bf16.msra.mxu0 %v2198_v12  ;;  %v123_v19 = vand.u32 4294901760, %v122_v13  ;;  %v130_v20 = vand.u32 4294901760, %v129_v14  ;;  %v137_v21 = vand.u32 4294901760, %v2200_v15  ;;  %v1970_v37 = vpack.c.bf16 %v129_v14, %v122_v13  ;;  %v27_v39 = vld [vmem:[%s2487_s0] sm:$0xff]  ;;  %v31_v43 = vld [vmem:[%s2489_s2 + $0x10] sm:$0xff]  ;;  %v32_v44 = vld [vmem:[%s2489_s2 + $0x18] sm:$0xff] }
   0x7   :  { %1960 = vmatprep.subr.bf16.mxu0 %v2129_v3  ;;  %v2212_v22 = vsub.f32 %v39_v11, %v2204_v17  ;;  %v144_v23 = vand.u32 4294901760, %v2202_v16  ;;  %v530_v41 = vand.u32 4294901760, %v29_v34  ;;  %v533_v42 = vand.u32 4294901760, %v30_v35  ;;  %s2132_s3 = smov [#allocation2]  }
   0x8   :  { %v124_v24 = vsub.f32 %v122_v13, %v123_v19  ;;  %v131_v25 = vsub.f32 %v129_v14, %v130_v20  ;;  %v138_v26 = vsub.f32 %v2200_v15, %v137_v21  ;;  %v1973_v45 = vpack.c.bf16 %v2202_v16, %v2200_v15  ;;  %s1587_s11 = sshll.u32 %s2132_s3, 4  ;;  %s1588_s11 = int_to_ptr.vmem [resolvable:$true] %s1587_s11 }
   0x9   :  { %v112_v27 = vand.u32 4294901760, %v2212_v22  ;;  %v145_v28 = vsub.f32 %v2202_v16, %v144_v23  ;;  %v527_v46 = vsel %vm37_vm0, %v27_v39, 0  ;;  %v2243_v47 = vsub.f32 %v29_v34, %v530_v41  ;;  %p2110_p1 = scmp.lt.s32.totalorder %s1588_s11, %s1588_s11 }
   0xa   :  { %1962 = vmatpush3.bf16.msra.mxu0 %v2207_v18  ;;  %v125_v29 = vand.u32 4294901760, %v124_v24  ;;  %v132_v30 = vand.u32 4294901760, %v131_v25  ;;  %v139_v31 = vand.u32 4294901760, %v138_v26  ;;  %v2245_v48 = vsub.f32 %v30_v35, %v533_v42  ;;  %v1025_v25 = vld [vmem:[%s2492_s5 + $0x10] sm:$0xff]  ;;  %v1026_v26 = vld [vmem:[%s2492_s5 + $0x18] sm:$0xff]  ;;  %v1027_v35 = vld [vmem:[%s2492_s5 + $0x20] sm:$0xff] }
   0xb   :  { %1969 = vmatprep.subr.bf16.mxu0 %v2129_v3  ;;  %v113_v32 = vsub.f32 %v2212_v22, %v112_v27  ;;  %v146_v33 = vand.u32 4294901760, %v145_v28  ;;  %v536_v49 = vand.u32 4294901760, %v31_v43  ;;  %v539_v50 = vand.u32 4294901760, %v32_v44 }
   0xc   :  { %v1964_v36 = vpack.c.bf16 %v132_v30, %v125_v29  ;;  %v2248_v51 = vand.u32 4294901760, %v527_v46  ;;  %v1982_v52 = vpack.c.bf16 %v130_v20, %v123_v19  ;;  %v611_v55 = vand.u32 4294901760, %v2243_v47  ;;  %v1023_v19 = vld [vmem:[%s2492_s5] sm:$0xff]  ;;  %v1024_v20 = vld [vmem:[%s2492_s5 + $0x8] sm:$0xff] }
   0xd   :  { %v114_v38 = vand.u32 4294901760, %v113_v32  ;;  %v1967_v40 = vpack.c.bf16 %v146_v33, %v139_v31  ;;  %v2255_v53 = vsub.f32 %v31_v43, %v536_v49  ;;  %v2257_v54 = vsub.f32 %v32_v44, %v539_v50 }
   0xe   :  { %1965 = vmatpush3.bf16.msra.mxu1 %v1964_v36  ;;  %v618_v56 = vand.u32 4294901760, %v2245_v48  ;;  %v2264_v57 = vsub.f32 %v527_v46, %v2248_v51  ;;  %v1985_v58 = vpack.c.bf16 %v144_v23, %v137_v21  ;;  %v612_v59 = vsub.f32 %v2243_v47, %v611_v55  ;;  %v1028_v36 = vld [vmem:[%s2492_s5 + $0x28] sm:$0xff] }
   0xf   :  { %1720 = vmatmul.mubr.f32.vlgmr.msra.gmra.mrb[0].mxu0 %v114_v38  ;;  %1966 = vmatprep.subr.bf16.mxu1 %v2129_v3  ;;  %v625_v61 = vand.u32 4294901760, %v2255_v53  ;;  %v632_v62 = vand.u32 4294901760, %v2257_v54  ;;  %v1994_v0 = vpack.c.bf16 %v533_v42, %v530_v41  ;;  %v1997_v7 = vpack.c.bf16 %v539_v50, %v536_v49  ;;  %v1030_v49 = vld [vmem:[%s2492_s5 + $0x38] sm:$0xff] }
  0x10   :  { %1971 = vmatpush3.bf16.msra.mxu0 %v1970_v37  ;;  %1741 = vmatprep.mubr.msk.f32.mxu0 %vm2130_vm1, %v2131_v10  ;;  %v619_v60 = vsub.f32 %v2245_v48, %v618_v56  ;;  %v600_v63 = vand.u32 4294901760, %v2264_v57  ;;  %v613_v1 = vand.u32 4294901760, %v612_v59  ;;  %v2006_v14 = vpack.c.bf16 %v2245_v48, %v2243_v47  ;;  %v1029_v48 = vld [vmem:[%s2492_s5 + $0x30] sm:$0xff] }
  0x11   :  { %1972 = vmatprep.subr.bf16.mxu0 %v2129_v3  ;;  %v626_v4 = vsub.f32 %v2255_v53, %v625_v61  ;;  %v633_v5 = vsub.f32 %v2257_v54, %v632_v62  ;;  %v2009_v16 = vpack.c.bf16 %v2257_v54, %v2255_v53  ;;  %v1043_v21 = vand.u32 4294901760, %v1023_v19 }
  0x12   :  { %1968 = vmatpush3.bf16.msra.mxu1 %v1967_v40  ;;  %v620_v2 = vand.u32 4294901760, %v619_v60  ;;  %v601_v6 = vsub.f32 %v2264_v57, %v600_v63  ;;  %v1049_v29 = vand.u32 4294901760, %v1025_v25  ;;  %v1052_v30 = vand.u32 4294901760, %v1026_v26 }
  0x13   :  { %1975 = vmatprep.subr.bf16.mxu1 %v2129_v3  ;;  %v627_v11 = vand.u32 4294901760, %v626_v4  ;;  %v2330_v23 = vsub.f32 %v1023_v19, %v1043_v21  ;;  %v1055_v41 = vand.u32 4294901760, %v1027_v35  ;;  %v1058_v42 = vand.u32 4294901760, %v1028_v36 }
  0x14   :  { %1974 = vmatpush3.bf16.msra.mxu0 %v1973_v45  ;;  %v2000_v9 = vpack.c.bf16 %v620_v2, %v613_v1  ;;  %v602_v13 = vand.u32 4294901760, %v601_v6  ;;  %v2348_v33 = vsub.f32 %v1025_v25, %v1049_v29  ;;  %v2350_v34 = vsub.f32 %v1026_v26, %v1052_v30 }
  0x15   :  { %1731 = vmatmul.mubr.f32.vlgmr.msra.gmra.mrb[0].mxu1 %v2204_v17  ;;  %1981 = vmatprep.subr.bf16.mxu0 %v2129_v3  ;;  %v2362_v46 = vsub.f32 %v1027_v35, %v1055_v41  ;;  %v2364_v47 = vsub.f32 %v1028_v36, %v1058_v42  ;;  %v1064_v53 = vand.u32 4294901760, %v1030_v49 }
  0x16   :  { %1977 = vmatpush3.bf16.msra.mxu1 %v2198_v12  ;;  %1752 = vmatprep.mubr.msk.f32.mxu1 %vm2130_vm1, %v2131_v10  ;;  %v1142_v39 = vand.u32 4294901760, %v2348_v33  ;;  %v1149_v40 = vand.u32 4294901760, %v2350_v34 }
  0x17   :  { %1742 = vmatmul.mubr.f32.vlgmr.msra.gmra.mrb[2].mxu0 %v2212_v22  ;;  %1978 = vmatprep.subr.bf16.mxu1 %v2129_v3  ;;  %v1046_v22 = vand.u32 4294901760, %v1024_v20  ;;  %v1156_v54 = vand.u32 4294901760, %v2362_v46 }
  0x18   :  { %1983 = vmatpush3.bf16.msra.mxu0 %v1982_v52  ;;  %1763 = vmatprep.mubr.msk.f32.mxu0 %vm2130_vm1, %v2131_v10  ;;  %v1143_v44 = vsub.f32 %v2348_v33, %v1142_v39  ;;  %v1150_v45 = vsub.f32 %v2350_v34, %v1149_v40  ;;  %v1061_v52 = vand.u32 4294901760, %v1029_v48  ;;  %v2418_v19 = vpack.c.bf16 %v1149_v40, %v1142_v39 }
  0x19   :  { %1984 = vmatprep.subr.bf16.mxu0 %v2129_v3  ;;  %v2332_v24 = vsub.f32 %v1024_v20, %v1046_v22  ;;  %v1157_v59 = vsub.f32 %v2362_v46, %v1156_v54  ;;  %v2384_v1 = vpack.c.bf16 %v1046_v22, %v1043_v21 }
  0x1a   :  { %1980 = vmatpush3.bf16.msra.mxu1 %v2207_v18  ;;  %v1144_v50 = vand.u32 4294901760, %v1143_v44 }
  0x1b   :  { %1987 = vmatprep.subr.bf16.mxu1 %v2129_v3  ;;  %v1135_v28 = vand.u32 4294901760, %v2332_v24 }
  0x1c   :  { %1986 = vmatpush3.bf16.msra.mxu0 %v1985_v58  ;;  %v2377_v58 = vsub.f32 %v1030_v49, %v1064_v53 }
  0x1d   :  { %1753 = vmatmul.mubr.f32.vlgmr.msra.gmra.mrb[2].mxu1 %v112_v27  ;;  %1993 = vmatprep.subr.bf16.mxu0 %v2129_v3  ;;  %v1128_v27 = vand.u32 4294901760, %v2330_v23  ;;  %v1136_v32 = vsub.f32 %v2332_v24, %v1135_v28 }
  0x1e   :  { %1989 = vmatpush3.bf16.msra.mxu1 %v2198_v12  ;;  %1774 = vmatprep.mubr.msk.f32.mxu1 %vm2130_vm1, %v2131_v10  ;;  %v634_v12 = vand.u32 4294901760, %v633_v5 }
  0x1f   :  { %1764 = vmatmul.mubr.f32.vlgmr.msra.gmra.mrb[4].mxu0 %v2204_v17  ;;  %1990 = vmatprep.subr.bf16.mxu1 %v2129_v3  ;;  %v1129_v31 = vsub.f32 %v2330_v23, %v1128_v27  ;;  %v1137_v38 = vand.u32 4294901760, %v1136_v32 }
  0x20   :  { %1995 = vmatpush3.bf16.msra.mxu0 %v1994_v0  ;;  %1785 = vmatprep.mubr.msk.f32.mxu0 %vm2130_vm1, %v2131_v10  ;;  %v2003_v15 = vpack.c.bf16 %v634_v12, %v627_v11  ;;  %v2396_v12 = vpack.c.bf16 %v1058_v42, %v1055_v41 }
  0x21   :  { %1996 = vmatprep.subr.bf16.mxu0 %v2129_v3  ;;  %v1130_v37 = vand.u32 4294901760, %v1129_v31 }
  0x22   :  { %1992 = vmatpush3.bf16.msra.mxu1 %v2207_v18  ;;  %v2021_v18 = vpack.c.bf16 %v632_v62, %v625_v61  ;;  %v1177_v62 = vand.u32 4294901760, %v2377_v58 }
  0x23   :  { %1999 = vmatprep.subr.bf16.mxu1 %v2129_v3  ;;  %v2042_v43 = vpack.c.bf16 %v1137_v38, %v1130_v37 }
  0x24   :  { %1998 = vmatpush3.bf16.msra.mxu0 %v1997_v7  ;;  %v1178_v4 = vsub.f32 %v2377_v58, %v1177_v62 }
  0x25   :  { %1775 = vmatmul.mubr.f32.vlgmr.msra.gmra.mrb[4].mxu1 %v2204_v17  ;;  %2005 = vmatprep.subr.bf16.mxu0 %v2129_v3  ;;  %v2018_v17 = vpack.c.bf16 %v618_v56, %v611_v55  ;;  %v1163_v55 = vand.u32 4294901760, %v2364_v47 }
  0x26   :  { %2001 = vmatpush3.bf16.msra.mxu1 %v2000_v9  ;;  %1796 = vmatprep.mubr.msk.f32.mxu1 %vm2130_vm1, %v2131_v10  ;;  %v2391_v9 = vpack.c.bf16 %v1052_v30, %v1049_v29 }
  0x27   :  { %1786 = vmatmul.mubr.f32.vlgmr.msra.gmra.mrb[6].mxu0 %v602_v13  ;;  %2002 = vmatprep.subr.bf16.mxu1 %v2129_v3  ;;  %v1164_v60 = vsub.f32 %v2364_v47, %v1163_v55  ;;  %v2400_v13 = vpack.c.bf16 %v1064_v53, %v1061_v52  ;;  %v2420_v20 = vpack.c.bf16 %v1163_v55, %v1156_v54 }
  0x28   :  { %2007 = vmatpush3.bf16.msra.mxu0 %v2006_v14  ;;  %1807 = vmatprep.mubr.msk.f32.mxu0 %vm2130_vm1, %v2131_v10  ;;  %v2054_v14 = vpack.c.bf16 %v2332_v24, %v2330_v23 }
  0x29   :  { %2008 = vmatprep.subr.bf16.mxu0 %v2129_v3 }
  0x2a   :  { %2004 = vmatpush3.bf16.msra.mxu1 %v2003_v15  ;;  %v2057_v15 = vpack.c.bf16 %v2350_v34, %v2348_v33 }
  0x2b   :  { %2011 = vmatprep.subr.bf16.mxu1 %v2129_v3 }
  0x2c   :  { %2010 = vmatpush3.bf16.msra.mxu0 %v2009_v16  ;;  %v2060_v16 = vpack.c.bf16 %v2364_v47, %v2362_v46 }
  0x2d   :  { %1797 = vmatmul.mubr.f32.vlgmr.msra.gmra.mrb[6].mxu1 %v2248_v51  ;;  %2017 = vmatprep.subr.bf16.mxu0 %v2129_v3 }
  0x2e   :  { %2013 = vmatpush3.bf16.msra.mxu1 %v1994_v0  ;;  %1818 = vmatprep.mubr.msk.f32.mxu1 %vm2130_vm1, %v2131_v10 }
  0x2f   :  { %1808 = vmatmul.mubr.f32.vlgmr.msra.gmra.mrb[8].mxu0 %v2264_v57  ;;  %2014 = vmatprep.subr.bf16.mxu1 %v2129_v3  ;;  %v2375_v57 = vsub.f32 %v1029_v48, %v1061_v52 }
  0x30   :  { %2019 = vmatpush3.bf16.msra.mxu0 %v2018_v17  ;;  %1829 = vmatprep.mubr.msk.f32.mxu0 %vm2130_vm1, %v2131_v10 }
  0x31   :  { %2020 = vmatprep.subr.bf16.mxu0 %v2129_v3  ;;  %v1170_v61 = vand.u32 4294901760, %v2375_v57  ;;  %v2063_v17 = vpack.c.bf16 %v2377_v58, %v2375_v57 }
  0x32   :  { %2016 = vmatpush3.bf16.msra.mxu1 %v1997_v7 }
  0x33   :  { %2023 = vmatprep.subr.bf16.mxu1 %v2129_v3  ;;  %v1171_v2 = vsub.f32 %v2375_v57, %v1170_v61  ;;  %v2422_v21 = vpack.c.bf16 %v1177_v62, %v1170_v61  ;;  %v1595_v61 = vld [vmem:[%s2491_s4] ss:$0 sm:$0xff] }
  0x34   :  { %2022 = vmatpush3.bf16.msra.mxu0 %v2021_v18  ;;  %v2416_v18 = vpack.c.bf16 %v1135_v28, %v1128_v27 }
  0x35   :  { %1819 = vmatmul.mubr.f32.vlgmr.msra.gmra.mrb[8].mxu1 %v600_v63  ;;  %2029 = vmatprep.subr.bf16.mxu0 %v2129_v3  ;;  %v1158_v63 = vand.u32 4294901760, %v1157_v59  ;;  %v1172_v6 = vand.u32 4294901760, %v1171_v2 }
  0x36   :  { %2025 = vmatpush3.bf16.msra.mxu1 %v1994_v0  ;;  %1840 = vmatprep.mubr.msk.f32.mxu1 %vm2130_vm1, %v2131_v10  ;;  %v1165_v0 = vand.u32 4294901760, %v1164_v60 }
  0x37   :  { %1830 = vmatmul.mubr.f32.vlgmr.msra.gmra.mrb[10].mxu0 %v2248_v51  ;;  %2026 = vmatprep.subr.bf16.mxu1 %v2129_v3 }
  0x38   :  { %1859 = vmatprep.mubr.msk.f32.mxu0 %vm2130_vm1, %v2131_v10  ;;  %v2048_v5 = vpack.c.bf16 %v1165_v0, %v1158_v63  ;;  %2031 = vmatpush3.bf16.msra.mxu0 %v2384_v1 }
  0x39   :  { %2032 = vmatprep.subr.bf16.mxu0 %v2129_v3 }
  0x3a   :  { %2028 = vmatpush3.bf16.msra.mxu1 %v1997_v7  ;;  %v1179_v7 = vand.u32 4294901760, %v1178_v4 }
  0x3b   :  { %2041 = vmatprep.subr.bf16.mxu1 %v2129_v3 }
  0x3c   :  { %v2051_v11 = vpack.c.bf16 %v1179_v7, %v1172_v6  ;;  %2034 = vmatpush3.bf16.msra.mxu0 %v2391_v9 }
  0x3d   :  { %1841 = vmatmul.mubr.f32.vlgmr.msra.gmra.mrb[10].mxu1 %v2248_v51  ;;  %v1151_v51 = vand.u32 4294901760, %v1150_v45  ;;  %2035 = vmatprep.subr.bf16.mxu0 %v2129_v3 }
  0x3e   :  { %1878 = vmatprep.mubr.msk.f32.mxu1 %vm2130_vm1, %v2131_v10  ;;  %2043 = vmatpush3.bf16.msra.mxu1 %v2042_v43 }
  0x3f   :  { %2044 = vmatprep.subr.bf16.mxu1 %v2129_v3  ;;  %v2045_v56 = vpack.c.bf16 %v1151_v51, %v1144_v50 }
  0x40   :  { %2037 = vmatpush3.bf16.msra.mxu0 %v2396_v12 }
  0x41   :  { %2038 = vmatprep.subr.bf16.mxu0 %v2129_v3 }
  0x42   :  { %2046 = vmatpush3.bf16.msra.mxu1 %v2045_v56 }
  0x43   :  { %2047 = vmatprep.subr.bf16.mxu1 %v2129_v3 }
  0x44   :  { %2040 = vmatpush3.bf16.msra.mxu0 %v2400_v13 }
  0x45   :  { %2053 = vmatprep.subr.bf16.mxu0 %v2129_v3 }
  0x46   :  { %2049 = vmatpush3.bf16.msra.mxu1 %v2048_v5 }
  0x47   :  { %2050 = vmatprep.subr.bf16.mxu1 %v2129_v3 }
  0x4a   :  { %2052 = vmatpush3.bf16.msra.mxu1 %v2051_v11 }
  0x4b   :  { %2065 = vmatprep.subr.bf16.mxu1 %v2129_v3 }
  0xe2   :  { %v116_v22 = vpop.f32.mrb[0].mxu0 }
  0xe3   :  { %v1721_v25 = vpop.f32.mrb[1].mxu0 }
  0xe8   :  { %v207_v26 = vpop.f32.mrb[0].mxu1 }
  0xe9   :  { %v208_v29 = vadd.f32 %v207_v26, %v116_v22  ;;  %v1732_v30 = vpop.f32.mrb[1].mxu1 }
  0xea   :  { %v287_v31 = vpop.f32.mrb[2].mxu0 }
  0xeb   :  { %v288_v32 = vadd.f32 %v287_v31, %v208_v29  ;;  %v1743_v35 = vpop.f32.mrb[3].mxu0 }
  0xf0   :  { %v364_v36 = vpop.f32.mrb[2].mxu1 }
  0xf1   :  { %v365_v23 = vadd.f32 %v364_v36, %v288_v32  ;;  %v1754_v37 = vpop.f32.mrb[3].mxu1 }
  0xf2   :  { %v447_v24 = vpop.f32.mrb[4].mxu0 }
  0xf3   :  { %v448_v27 = vadd.f32 %v447_v24, %v365_v23  ;;  %v1765_v28 = vpop.f32.mrb[5].mxu0 }
  0xf8   :  { %v522_v38 = vpop.f32.mrb[4].mxu1 }
  0xf9   :  { %v523_v39 = vadd.f32 %v522_v38, %v448_v27  ;;  %v1776_v40 = vpop.f32.mrb[5].mxu1 }
  0xfa   :  { %v604_v41 = vpop.f32.mrb[6].mxu0 }
  0xfb   :  { %v605_v42 = vadd.f32 %v604_v41, %v523_v39  ;;  %v1787_v43 = vpop.f32.mrb[7].mxu0 }
 0x100   :  { %v695_v44 = vpop.f32.mrb[6].mxu1 }
 0x101   :  { %v696_v45 = vadd.f32 %v695_v44, %v605_v42  ;;  %v1798_v48 = vpop.f32.mrb[7].mxu1 }
 0x102   :  { %v775_v49 = vpop.f32.mrb[8].mxu0 }
 0x103   :  { %v776_v50 = vadd.f32 %v775_v49, %v696_v45  ;;  %v1809_v51 = vpop.f32.mrb[9].mxu0 }
 0x108   :  { %v852_v52 = vpop.f32.mrb[8].mxu1 }
 0x109   :  { %v853_v53 = vadd.f32 %v852_v52, %v776_v50  ;;  %v1820_v54 = vpop.f32.mrb[9].mxu1 }
 0x10a   :  { %v935_v55 = vpop.f32.mrb[10].mxu0 }
 0x10b   :  { %v936_v56 = vadd.f32 %v935_v55, %v853_v53  ;;  %v1831_v59 = vpop.f32.mrb[11].mxu0 }
 0x110   :  { %v1010_v60 = vpop.f32.mrb[10].mxu1 }
 0x111   :  { %v1011_v62 = vadd.f32 %v1010_v60, %v936_v56  ;;  %v1842_v63 = vpop.f32.mrb[11].mxu1 }
 0x113   :  { %v1021_v0 = vadd.f32 %v1595_v61, %v1011_v62 }
 0x115   :  { %v1022_v2 = vmax.f32 %v1021_v0, 0.0 }
 0x117   :  { %v1040_v4 = vsel %vm1038_vm2, %v1022_v2, 0 }
 0x118   :  { %v1115_v5 = vand.u32 4294901760, %v1040_v4 }
 0x11a   :  { %v1116_v6 = vsub.f32 %v1040_v4, %v1115_v5  ;;  %1879 = vmatmul.mubr.f32.vlgmr.msra.gmra.mrb[12].mxu1 %v1115_v5 }
 0x11b   :  { %2067 = vmatpush3.bf16.msra.mxu1 %v2384_v1  ;;  %1916 = vmatprep.mubr.msk.f32.mxu1 %vm2130_vm1, %v2131_v10 }
 0x11c   :  { %2068 = vmatprep.subr.bf16.mxu1 %v2129_v3  ;;  %v1117_v7 = vand.u32 4294901760, %v1116_v6 }
 0x11e   :  { %v1118_v11 = vsub.f32 %v1116_v6, %v1117_v7 }
 0x11f   :  { %2070 = vmatpush3.bf16.msra.mxu1 %v2391_v9 }
 0x120   :  { %2071 = vmatprep.subr.bf16.mxu1 %v2129_v3  ;;  %v1119_v22 = vand.u32 4294901760, %v1118_v11 }
 0x122   :  { %1860 = vmatmul.mubr.f32.vlgmr.msra.gmra.mrb[12].mxu0 %v1119_v22 }
 0x123   :  { %2055 = vmatpush3.bf16.msra.mxu0 %v2054_v14  ;;  %2073 = vmatpush3.bf16.msra.mxu1 %v2396_v12 }
 0x124   :  { %2056 = vmatprep.subr.bf16.mxu0 %v2129_v3  ;;  %2074 = vmatprep.subr.bf16.mxu1 %v2129_v3 }
 0x125   :  { %1897 = vmatprep.mubr.msk.f32.mxu0 %vm2130_vm1, %v2131_v10 }
 0x127   :  { %2058 = vmatpush3.bf16.msra.mxu0 %v2057_v15  ;;  %2076 = vmatpush3.bf16.msra.mxu1 %v2400_v13 }
 0x128   :  { %2059 = vmatprep.subr.bf16.mxu0 %v2129_v3  ;;  %2089 = vmatprep.subr.bf16.mxu1 %v2129_v3 }
 0x12a   :  { %1917 = vmatmul.mubr.f32.vlgmr.msra.gmra.mrb[14].mxu1 %v1117_v7 }
 0x12b   :  { %2061 = vmatpush3.bf16.msra.mxu0 %v2060_v16  ;;  %2091 = vmatpush3.bf16.msra.mxu1 %v2384_v1 }
 0x12c   :  { %2062 = vmatprep.subr.bf16.mxu0 %v2129_v3  ;;  %2092 = vmatprep.subr.bf16.mxu1 %v2129_v3 }
 0x12d   :  { %1954 = vmatprep.mubr.msk.f32.mxu1 %vm2130_vm1, %v2131_v10 }
 0x12f   :  { %2064 = vmatpush3.bf16.msra.mxu0 %v2063_v17  ;;  %2094 = vmatpush3.bf16.msra.mxu1 %v2391_v9 }
 0x130   :  { %2077 = vmatprep.subr.bf16.mxu0 %v2129_v3  ;;  %2095 = vmatprep.subr.bf16.mxu1 %v2129_v3 }
 0x132   :  { %1898 = vmatmul.mubr.f32.vlgmr.msra.gmra.mrb[14].mxu0 %v1116_v6 }
 0x133   :  { %2079 = vmatpush3.bf16.msra.mxu0 %v2416_v18  ;;  %2097 = vmatpush3.bf16.msra.mxu1 %v2396_v12 }
 0x134   :  { %2080 = vmatprep.subr.bf16.mxu0 %v2129_v3  ;;  %2098 = vmatprep.subr.bf16.mxu1 %v2129_v3 }
 0x135   :  { %1935 = vmatprep.mubr.msk.f32.mxu0 %vm2130_vm1, %v2131_v10  ;;  %v1596_v10 = vld [vmem:[%s2493_s6] ss:$0 sm:$0xff]  ;;  %s2105_s6 = scalar_lea.vmem %s1588_s11, 128 }
 0x136   :  { %p2106_p0 = scmp.ne.s32.totalorder %s1588_s11, %s2105_s6  ;;  %p2111_p2 = scmp.lt.s32.totalorder %s2105_s6, %s2105_s6 }
 0x137   :  { %2082 = vmatpush3.bf16.msra.mxu0 %v2418_v19  ;;  %2100 = vmatpush3.bf16.msra.mxu1 %v2400_v13 }
 0x138   :  { %2083 = vmatprep.subr.bf16.mxu0 %v2129_v3  ;;  %p2112_p3 = por %p2111_p2, %p2110_p1 }
 0x13a   :  { %1955 = vmatmul.mubr.f32.vlgmr.msra.gmra.mrb[16].mxu1 %v1115_v5  ;;  %p2113_p4 = pnand %p2112_p3, %p2106_p0 }
 0x13b   :  { %2085 = vmatpush3.bf16.msra.mxu0 %v2420_v20 }
 0x13c   :  { %2086 = vmatprep.subr.bf16.mxu0 %v2129_v3 }
 0x13f   :  { %2088 = vmatpush3.bf16.msra.mxu0 %v2422_v21 }
 0x142   :  { %1936 = vmatmul.mubr.f32.vlgmr.msra.gmra.mrb[16].mxu0 %v1115_v5 }
 0x1ed   :  { %v1232_v33 = vpop.f32.mrb[12].mxu1 }
 0x1ee   :  { %v1880_v34 = vpop.f32.mrb[13].mxu1 }
 0x1f5   :  { %v1121_v46 = vpop.f32.mrb[12].mxu0 }
 0x1f6   :  { %v1122_v47 = vadd.f32 %v1596_v10, %v1121_v46  ;;  %v1861_v57 = vpop.f32.mrb[13].mxu0 }
 0x1f8   :  { %v1233_v58 = vadd.f32 %v1232_v33, %v1122_v47 }
 0x1fd   :  { %v1401_v1 = vpop.f32.mrb[14].mxu1 }
 0x1fe   :  { %v1918_v9 = vpop.f32.mrb[15].mxu1 }
 0x205   :  { %v1320_v12 = vpop.f32.mrb[14].mxu0 }
 0x206   :  { %v1321_v13 = vadd.f32 %v1320_v12, %v1233_v58  ;;  %v1899_v14 = vpop.f32.mrb[15].mxu0 }
 0x208   :  { %v1402_v15 = vadd.f32 %v1401_v1, %v1321_v13 }
 0x20d   :  { %v1575_v3 = vpop.f32.mrb[16].mxu1 }
 0x20e   :  { %v1956_v16 = vpop.f32.mrb[17].mxu1 }
 0x215   :  { %v1496_v17 = vpop.f32.mrb[16].mxu0 }
 0x216   :  { %v1497_v18 = vadd.f32 %v1496_v17, %v1402_v15  ;;  %v1937_v19 = vpop.f32.mrb[17].mxu0 }
 0x218   :  { %v1576_v20 = vadd.f32 %v1575_v3, %v1497_v18 }
 0x21a   :  { %v1579_v21 = vadd.f32 %v1576_v20, %v2190_v8 }
 0x21c   :  { %1580 = vst.msk [vmem:[#allocation2] sm:$0xff] %vm37_vm0, %v1579_v21 }
 0x21d   :  { %2116 = shalt.err (!%p2113_p4)
}
 0x21e   :  { %s2117_s14 = scalar_lea.hbm %s2494_s7, 128 }
 0x21f   :  { %p2118_p5 = scmp.ne.s32.totalorder %s2494_s7, %s2117_s14  ;;  %p2121_p6 = scmp.lt.u32.totalorder %s2117_s14, %s2494_s7 }
 0x221   :  { %p2123_p7 = pnand %p2121_p6, %p2118_p5 }
 0x223   :  { %2126 = shalt.err (!%p2123_p7)
}
 0x224   :  { %1590 = dma.vmem_to_hbm [thread:$0]  %s1588_s11, 128, %s2494_s7, [#allocation3]  }
 0x225   :  { %2127 = dma.done.wait [#allocation3], 128  }
 0x226   :  { %2128 = vsyncadd [#allocation3], 4294967168 }
 0x227   :  { %1594 = vsyncpa [#allocation3], 1 }

</bundles_post_ra>
